<compile_context>
chip_gen: v5e
topology: v5e:2x2
jax: 0.10.0
libtpu: 0.0.40
codegen_flags: <defaults>
</compile_context>

<pallas_src>
import functools

import jax
import jax.numpy as jnp
from jax.experimental import pallas as pl
from jax.experimental.pallas import tpu as pltpu

EPS = 1e-5
EXPANSION = 4
LANE = 128
TILE_M = 256


# ----------------------------------------------------------------------------- helpers
def _round_up(x, m):
    return (x + m - 1) // m * m


def _pad_to(a, axis, target):
    pad = target - a.shape[axis]
    if pad == 0:
        return a
    cfg = [(0, 0)] * a.ndim
    cfg[axis] = (0, pad)
    return jnp.pad(a, cfg)


def _fold_bn(gamma, beta, mean, var):
    scale = gamma / jnp.sqrt(var + EPS)
    bias = beta - mean * scale
    return scale, bias


# ----------------------------------------------------------------------------- kernels
def _mm_bias_kernel(x_ref, w_ref, b_ref, o_ref, *, relu):
    """out = relu?( (x @ w_bn_folded) + bias )  — one M tile per grid step."""
    acc = jnp.dot(x_ref[...], w_ref[...], preferred_element_type=jnp.float32)
    y = acc + b_ref[...]
    if relu:
        y = jnp.maximum(y, 0.0)
    o_ref[...] = y.astype(o_ref.dtype)


def _mm_bias_residual_relu_kernel(y_ref, w3_ref, b3_ref, xd_ref, wd_ref, bd_ref,
                                  o_ref):
    """out = relu( (y @ w3 + b3) + (xd @ wd + bd) )  — residual fused in-tile."""
    main = jnp.dot(y_ref[...], w3_ref[...],
                   preferred_element_type=jnp.float32) + b3_ref[...]
    res = jnp.dot(xd_ref[...], wd_ref[...],
                  preferred_element_type=jnp.float32) + bd_ref[...]
    o_ref[...] = jnp.maximum(main + res, 0.0).astype(o_ref.dtype)


def _conv3x3_bias_relu_kernel(x_ref, w_ref, b_ref, o_ref, *, H, W):
    """3x3 conv (stride 1, pad already applied) via 9 accumulated MXU dots.

    x_ref : (1, H+2, W+2, C)   spatially padded input image (bf16)
    w_ref : (9, C, Cout)       BN-folded taps (bf16)
    b_ref : (1, Cout)          bias (f32)
    o_ref : (1, H*W, Cout)
    """
    co = w_ref.shape[-1]
    acc = jnp.zeros((H * W, co), jnp.float32)
    for dh in range(3):
        for dw in range(3):
            win = x_ref[0, dh:dh + H, dw:dw + W, :]            # (H, W, C)
            acc = acc + jnp.dot(win.reshape(H * W, -1),
                                w_ref[dh * 3 + dw],
                                preferred_element_type=jnp.float32)
    y = jnp.maximum(acc + b_ref[...], 0.0)
    o_ref[0] = y.astype(o_ref.dtype)


# ----------------------------------------------------------------------------- pallas wrappers
def fused_matmul_bias(x2d, w, bias, *, relu, out_dtype, tm=TILE_M):
    M, K = x2d.shape
    N = w.shape[1]
    Mp = _round_up(M, tm)
    x2d = _pad_to(x2d, 0, Mp)
    kernel = functools.partial(_mm_bias_kernel, relu=relu)
    flops = 2 * Mp * K * N
    bytes_accessed = int(Mp * K * 2 + K * N * 2 + N * 4
                         + Mp * N * jnp.dtype(out_dtype).itemsize)
    out = pl.pallas_call(
        kernel,
        out_shape=jax.ShapeDtypeStruct((Mp, N), out_dtype),
        grid=(Mp // tm,),
        in_specs=[
            pl.BlockSpec((tm, K), lambda i: (i, 0)),
            pl.BlockSpec((K, N), lambda i: (0, 0)),
            pl.BlockSpec((1, N), lambda i: (0, 0)),
        ],
        out_specs=pl.BlockSpec((tm, N), lambda i: (i, 0)),
        compiler_params=pltpu.CompilerParams(dimension_semantics=("parallel",)),
        cost_estimate=pl.CostEstimate(flops=flops, transcendentals=0,
                                      bytes_accessed=bytes_accessed),
    )(x2d, w, bias)
    return out[:M]


def fused_matmul_bias_residual_relu(y2d, w3, b3, xd2d, wd, bd, *, out_dtype,
                                    tm=TILE_M):
    M, K1 = y2d.shape
    K2 = xd2d.shape[1]
    N = w3.shape[1]
    Mp = _round_up(M, tm)
    y2d = _pad_to(y2d, 0, Mp)
    xd2d = _pad_to(xd2d, 0, Mp)
    flops = 2 * Mp * (K1 + K2) * N
    bytes_accessed = int(Mp * (K1 + K2) * 2 + (K1 + K2) * N * 2 + 2 * N * 4
                         + Mp * N * jnp.dtype(out_dtype).itemsize)
    out = pl.pallas_call(
        _mm_bias_residual_relu_kernel,
        out_shape=jax.ShapeDtypeStruct((Mp, N), out_dtype),
        grid=(Mp // tm,),
        in_specs=[
            pl.BlockSpec((tm, K1), lambda i: (i, 0)),
            pl.BlockSpec((K1, N), lambda i: (0, 0)),
            pl.BlockSpec((1, N), lambda i: (0, 0)),
            pl.BlockSpec((tm, K2), lambda i: (i, 0)),
            pl.BlockSpec((K2, N), lambda i: (0, 0)),
            pl.BlockSpec((1, N), lambda i: (0, 0)),
        ],
        out_specs=pl.BlockSpec((tm, N), lambda i: (i, 0)),
        compiler_params=pltpu.CompilerParams(dimension_semantics=("parallel",)),
        cost_estimate=pl.CostEstimate(flops=flops, transcendentals=0,
                                      bytes_accessed=bytes_accessed),
    )(y2d, w3, b3, xd2d, wd, bd)
    return out[:M]


def fused_conv3x3_bias_relu(x_nhwc, w9, bias, *, out_dtype):
    """x_nhwc: (N,H,W,C) bf16; w9: (9,C,Co) bf16; bias: (1,Co) f32 -> (N*H*W, Co)."""
    N, H, W, C = x_nhwc.shape
    Co = w9.shape[-1]
    xpad = jnp.pad(x_nhwc, ((0, 0), (1, 1), (1, 1), (0, 0)))
    Hp, Wp = H + 2, W + 2
    kernel = functools.partial(_conv3x3_bias_relu_kernel, H=H, W=W)
    flops = 2 * N * H * W * 9 * C * Co
    bytes_accessed = int(N * Hp * Wp * C * 2 + 9 * C * Co * 2 + Co * 4
                         + N * H * W * Co * jnp.dtype(out_dtype).itemsize)
    out = pl.pallas_call(
        kernel,
        out_shape=jax.ShapeDtypeStruct((N, H * W, Co), out_dtype),
        grid=(N,),
        in_specs=[
            pl.BlockSpec((1, Hp, Wp, C), lambda n: (n, 0, 0, 0)),
            pl.BlockSpec((9, C, Co), lambda n: (0, 0, 0)),
            pl.BlockSpec((1, Co), lambda n: (0, 0)),
        ],
        out_specs=pl.BlockSpec((1, H * W, Co), lambda n: (n, 0, 0)),
        compiler_params=pltpu.CompilerParams(dimension_semantics=("parallel",)),
        cost_estimate=pl.CostEstimate(flops=flops, transcendentals=0,
                                      bytes_accessed=bytes_accessed),
    )(xpad, w9, bias)
    return out.reshape(N * H * W, Co)


# ----------------------------------------------------------------------------- forward
def bottleneck_forward(x_nchw, params, stride=1, tile_m=TILE_M):
    """HRNet Bottleneck forward (eval-mode BN) with fused Pallas kernels."""
    N, Cin, H, W = x_nchw.shape
    planes = params["w1"].shape[1]
    out_c = planes * EXPANSION

    cin_p = _round_up(Cin, LANE)
    p_p = _round_up(planes, LANE)
    o_p = _round_up(out_c, LANE)

    # ---- fold BN into weights, pad channels to lane multiples, cast to bf16
    s1, b1 = _fold_bn(*params["bn1"])
    s2, b2 = _fold_bn(*params["bn2"])
    s3, b3 = _fold_bn(*params["bn3"])
    sd, bd = _fold_bn(*params["bnd"])

    w1 = _pad_to(_pad_to(params["w1"] * s1[None, :], 0, cin_p), 1, p_p)
    w1 = w1.astype(jnp.bfloat16)
    b1p = _pad_to(b1[None, :], 1, p_p)

    w2 = params["w2"] * s2[None, None, None, :]
    w2 = _pad_to(_pad_to(w2, 2, p_p), 3, p_p).reshape(9, p_p, p_p)
    w2 = w2.astype(jnp.bfloat16)
    b2p = _pad_to(b2[None, :], 1, p_p)

    w3 = _pad_to(_pad_to(params["w3"] * s3[None, :], 0, p_p), 1, o_p)
    w3 = w3.astype(jnp.bfloat16)
    b3p = _pad_to(b3[None, :], 1, o_p)

    wd = _pad_to(_pad_to(params["wd"] * sd[None, :], 0, cin_p), 1, o_p)
    wd = wd.astype(jnp.bfloat16)
    bdp = _pad_to(bd[None, :], 1, o_p)

    # ---- input: NCHW -> NHWC, pad channels, bf16
    x = jnp.transpose(x_nchw, (0, 2, 3, 1))
    x = _pad_to(x, 3, cin_p).astype(jnp.bfloat16)           # (N,H,W,cin_p)

    # ---- conv1 (1x1) + bn1 + relu  (tiled fused matmul)
    y1 = fused_matmul_bias(x.reshape(N * H * W, cin_p), w1, b1p,
                           relu=True, out_dtype=jnp.bfloat16, tm=tile_m)

    # ---- conv2 (3x3, pad=1) + bn2 + relu  (in-kernel 9-tap accumulation)
    y2 = fused_conv3x3_bias_relu(y1.reshape(N, H, W, p_p), w2, b2p,
                                 out_dtype=jnp.bfloat16)     # (N*H*W, p_p)
    if stride > 1:
        y2 = y2.reshape(N, H, W, p_p)[:, ::stride, ::stride, :]
        Ho, Wo = y2.shape[1], y2.shape[2]
        y2 = y2.reshape(N * Ho * Wo, p_p)
        xd = x[:, ::stride, ::stride, :].reshape(N * Ho * Wo, cin_p)
    else:
        Ho, Wo = H, W
        xd = x.reshape(N * H * W, cin_p)

    # ---- conv3 (1x1) + bn3  +  downsample(1x1)+bnd  + add + relu  (one kernel)
    out2d = fused_matmul_bias_residual_relu(y2, w3, b3p, xd, wd, bdp,
                                            out_dtype=jnp.float32, tm=tile_m)

    out = out2d[:, :out_c].reshape(N, Ho, Wo, out_c)
    return jnp.transpose(out, (0, 3, 1, 2))                  # back to NCHW


# ----------------------------------------------------------------------------- reference (pure JAX f32)
def _ref_forward(x_nchw, params, stride=1):
    def bn(x, g, b, m, v):
        return (x - m[None, :, None, None]) / jnp.sqrt(v[None, :, None, None] + EPS) \
            * g[None, :, None, None] + b[None, :, None, None]

    def conv1x1(x, w, s):                              # w: (Cin, Cout)
        wk = jnp.transpose(w, (1, 0))[:, :, None, None]
        return jax.lax.conv_general_dilated(
            x, wk, (s, s), "VALID", dimension_numbers=("NCHW", "OIHW", "NCHW"))

    def conv3x3(x, w, s):                              # w: (3,3,Cin,Cout)
        wk = jnp.transpose(w, (3, 2, 0, 1))
        return jax.lax.conv_general_dilated(
            x, wk, (s, s), ((1, 1), (1, 1)),
            dimension_numbers=("NCHW", "OIHW", "NCHW"))

    out = jax.nn.relu(bn(conv1x1(x_nchw, params["w1"], 1), *params["bn1"]))
    out = jax.nn.relu(bn(conv3x3(out, params["w2"], stride), *params["bn2"]))
    out = bn(conv1x1(out, params["w3"], 1), *params["bn3"])
    res = bn(conv1x1(x_nchw, params["wd"], stride), *params["bnd"])
    return jax.nn.relu(out + res)


# ----------------------------------------------------------------------------- params
def init_params(key, inplanes, planes):
    ks = jax.random.split(key, 8)
    out_c = planes * EXPANSION

    def bn_params(k, c):
        k1, k2, k3, k4 = jax.random.split(k, 4)
        gamma = jax.random.uniform(k1, (c,), jnp.float32, 0.5, 1.5)
        beta = 0.1 * jax.random.normal(k2, (c,), jnp.float32)
        mean = 0.1 * jax.random.normal(k3, (c,), jnp.float32)
        var = jax.random.uniform(k4, (c,), jnp.float32, 0.5, 1.5)
        return (gamma, beta, mean, var)

    return {
        "w1": 0.1 * jax.random.normal(ks[0], (inplanes, planes), jnp.float32),
        "bn1": bn_params(ks[1], planes),
        "w2": 0.1 * jax.random.normal(ks[2], (3, 3, planes, planes), jnp.float32),
        "bn2": bn_params(ks[3], planes),
        "w3": 0.1 * jax.random.normal(ks[4], (planes, out_c), jnp.float32),
        "bn3": bn_params(ks[5], out_c),
        "wd": 0.1 * jax.random.normal(ks[6], (inplanes, out_c), jnp.float32),
        "bnd": bn_params(ks[7], out_c),
    }


# ----------------------------------------------------------------------------- main
if __name__ == "__main__":
    key = jax.random.PRNGKey(0)
    k_x, k_p = jax.random.split(key)

    batch, inplanes, planes, H, W = 2, 16, 8, 16, 16
    stride = 1

    x = jax.random.normal(k_x, (batch, inplanes, H, W), jnp.float32)
    params = init_params(k_p, inplanes, planes)

    out = bottleneck_forward(x, params, stride=stride)
    out = jax.block_until_ready(out)

    ref = jax.block_until_ready(_ref_forward(x, params, stride=stride))
    assert out.shape == (batch, planes * EXPANSION, H, W), out.shape
    err = float(jnp.max(jnp.abs(out - ref)))
    assert jnp.allclose(out, ref, atol=3e-2, rtol=3e-2), err

    print("KERNEL_OK")
</pallas_src>

<mosaic_0001>
module attributes {stable_mosaic.version = 11 : i64} {
  func.func @_mm_bias_kernel(%arg0: i32, %arg1: memref<256x128xbf16, #tpu.memory_space<vmem>>, %arg2: memref<128x128xbf16, #tpu.memory_space<vmem>>, %arg3: memref<1x128xf32, #tpu.memory_space<vmem>>, %arg4: memref<256x128xbf16, #tpu.memory_space<vmem>>) attributes {dimension_semantics = [#tpu.dimension_semantics<parallel>], iteration_bounds = array<i64: 2>, scalar_prefetch = 0 : i64, scratch_operands = 0 : i64, tpu.core_type = #tpu.core_type<tc>, window_params = [{transform_indices = @transform_0, window_bounds = array<i64: 256, 128>}, {pipeline_mode = #tpu.pipeline_mode<synchronous>, transform_indices = @transform_1, window_bounds = array<i64: 128, 128>}, {pipeline_mode = #tpu.pipeline_mode<synchronous>, transform_indices = @transform_2, window_bounds = array<i64: 1, 128>}, {transform_indices = @transform_3, window_bounds = array<i64: 256, 128>}]} {
    %c0 = arith.constant 0 : index
    %c0_0 = arith.constant 0 : index
    %0 = vector.load %arg1[%c0, %c0_0] : memref<256x128xbf16, #tpu.memory_space<vmem>>, vector<256x128xbf16>
    %c0_1 = arith.constant 0 : index
    %c0_2 = arith.constant 0 : index
    %1 = vector.load %arg2[%c0_1, %c0_2] : memref<128x128xbf16, #tpu.memory_space<vmem>>, vector<128x128xbf16>
    %cst = arith.constant dense<0.000000e+00> : vector<256x128xf32>
    %2 = tpu.matmul %0, %1, %cst {dimension_numbers = #tpu.dot_dimension_numbers<[1], [0], [0], [1], [0, 0, 1, 1], [], []>} : vector<256x128xbf16>, vector<128x128xbf16>, vector<256x128xf32> -> vector<256x128xf32>
    %c0_3 = arith.constant 0 : index
    %c0_4 = arith.constant 0 : index
    %3 = vector.load %arg3[%c0_3, %c0_4] : memref<1x128xf32, #tpu.memory_space<vmem>>, vector<1x128xf32>
    %4 = vector.broadcast %3 : vector<1x128xf32> to vector<256x128xf32>
    %5 = arith.addf %2, %4 : vector<256x128xf32>
    %cst_5 = arith.constant 0.000000e+00 : f32
    %6 = vector.broadcast %cst_5 : f32 to vector<256x128xf32>
    %7 = arith.maximumf %5, %6 : vector<256x128xf32>
    %8 = arith.truncf %7 : vector<256x128xf32> to vector<256x128xbf16>
    %c0_6 = arith.constant 0 : index
    %c0_7 = arith.constant 0 : index
    %9 = vector.load %arg4[%c0_6, %c0_7] : memref<256x128xbf16, #tpu.memory_space<vmem>>, vector<256x128xbf16>
    tpu.vector_store %arg4[%c0_6, %c0_7], %8 {strides = array<i32>} : memref<256x128xbf16, #tpu.memory_space<vmem>>, vector<256x128xbf16>,
    return
  }
  func.func @transform_0(%arg0: i32) -> (i32, i32) {
    %c0_i32 = arith.constant 0 : i32
    %c0_i32_0 = arith.constant 0 : i32
    return %arg0, %c0_i32 : i32, i32
  }
  func.func @transform_1(%arg0: i32) -> (i32, i32) {
    %c0_i32 = arith.constant 0 : i32
    %c0_i32_0 = arith.constant 0 : i32
    %c0_i32_1 = arith.constant 0 : i32
    return %c0_i32, %c0_i32_0 : i32, i32
  }
  func.func @transform_2(%arg0: i32) -> (i32, i32) {
    %c0_i32 = arith.constant 0 : i32
    %c0_i32_0 = arith.constant 0 : i32
    %c0_i32_1 = arith.constant 0 : i32
    return %c0_i32, %c0_i32_0 : i32, i32
  }
  func.func @transform_3(%arg0: i32) -> (i32, i32) {
    %c0_i32 = arith.constant 0 : i32
    %c0_i32_0 = arith.constant 0 : i32
    return %arg0, %c0_i32 : i32, i32
  }
}

</mosaic_0001>

<bundles_post_ra>
// kernel: tpu_custom_call.1
= control target key start
LH: loop header
LB: loop body
LE: loop exit
PB: predicated region body
PF: predicated region fallthrough
CT: control target
= control target key end

     0   :  { %8 = vsyncpa [#allocation3], 0  ;;  %s1388_s0 = inlined_call_operand.hbm [shape: bf16[512,128], index: 0, kind: input, shape index: {}]   ;;  %s1389_s1 = inlined_call_operand.hbm [shape: bf16[128,128], index: 1, kind: input, shape index: {}]   ;;  %s1390_s2 = inlined_call_operand.vmem [shape: f32[1,128], index: 2, kind: input, shape index: {}]   ;;  %s1391_s3 = inlined_call_operand.hbm [shape: bf16[512,128], index: 3, kind: output, shape index: {}]  }
   0x1   :  { %10 = vsyncpa [#allocation3 + $0x1], 0 }
   0x2   :  { %11 = vsyncpa [#allocation6], 0 }
   0x3   :  { %12 = vsyncpa [#allocation4], 0 }
   0x4   :  { %14 = vsyncpa [#allocation4 + $0x1], 0  ;;  %s1166_s12 = smov 0   ;;  %s1168_s13 = smov 0  }
   0x5   :  { %s1170_s14 = smov 0   ;;  %s1172_s15 = smov 0  }
   0x6 LB: > { %s1187_s16 = sadd.s32 4294967295, %s1139_s15   ;;  %s690_s17 = sadd.s32 4294967294, %s1139_s15   ;;  %s1139_s15 = sphi %s1172_s15, %s1401_s15   ;;  %s1135_s14 = sphi %s1170_s14, %s1400_s14   ;;  %s1131_s13 = sphi %s1168_s13, %s1399_s13   ;;  %s1127_s12 = sphi %s1166_s12, %s1398_s12  }
   0x7   : > { %p40_p0 = scmp.ne.s32.totalorder %s1131_s13, %s1127_s12  ;;  %p41_p1 = scmp.eq.s32.totalorder %s1187_s16, 0 }
   0x8   : > { %p106_p2 = scmp.eq.s32.totalorder %s1187_s16, 1  ;;  %p112_p3 = scmp.eq.s32.totalorder %s690_s17, 1 }
   0x9   : > { %p1196_p4 = por %p41_p1, %p40_p0  ;;  %p691_p5 = scmp.ge.s32.totalorder %s1139_s15, 1 }
   0xa   : > { %p1201_p6 = por %p112_p3, %p40_p0  ;;  %p119_p7 = scmp.lt.s32.totalorder %s1139_s15, 3 }
   0xb   : > { %s130_s22 = sshll.u32 %s1389_s1, 4  ;;  %s1141_s24 = smov [#allocation5]   ;;  %s131_s22 = int_to_ptr.hbm [resolvable:$true] %s130_s22 }
   0xc   : > { %p1209_p8 = pnand %p691_p5, %p119_p7  ;;  %s132_s25 = sshll.u32 %s1141_s24, 4  ;;  %s133_s25 = int_to_ptr.vmem [resolvable:$true] %s132_s25 }
   0xd   : > { %s1219_s26 = sadd.s32 1, %s1139_s15   ;;  %s1142_s27 = smov 64  }
   0xe   : > { %p955_p9 = pneg %p1209_p8  ;;  %s1143_s28 = smov 4  }
   0xf   : > { %s24_s29 = ssub.s32 %s1139_s15, %s1219_s26  ;;  %s27_s30 = sadd.s32 1, %s1135_s14 }
  0x10   : > { %p956_p10 = pnand %p955_p9, %p41_p1  ;;  %p25_p12 = scmp.eq.s32.totalorder %s24_s29, 0 }
  0x11   : > { %p34_p13 = scmp.ne.s32.totalorder %s1135_s14, %s1131_s13  ;;  %p35_p0 = scmp.eq.s32.totalorder %s1139_s15, 0 }
  0x12   : > { %958 = dma.hbm_to_vmem [thread:$0]  (!%p956_p10), %s131_s22, 1024, %s133_s25, [#allocation6], %s1142_s27, %s1142_s27, %s1143_s28  }
  0x13   : > { %s1231_s4 = scalar_select %p25_p12, %s1135_s14, %s27_s30  }
  0x14   : > { %p1235_p3 = por %p106_p2, %p34_p13  ;;  %p968_p5 = scmp.lt.s32.totalorder %s1139_s15, 2 }
  0x15   : > { %s149_s6 = sand.u32 1, %s1135_s14   ;;  %s802_s7 = sshll.u32 %s1139_s15, 7 }
  0x16   : > { %p36_p7 = por %p35_p0, %p34_p13  ;;  %s694_s8 = sshll.u32 %s149_s6, 7 }
  0x17   : > { %s158_s11 = scalar_lea.hbm %s1388_s0, %s802_s7  ;;  %s153_s20 = scalar_lea.vmem [#allocation2], %s694_s8 }
  0x18   : > { %s159_s17 = sshll.u32 %s158_s11, 4  ;;  %s161_s21 = sshll.u32 %s153_s20, 4  ;;  %s160_s17 = int_to_ptr.hbm [resolvable:$true] %s159_s17  ;;  %s162_s21 = int_to_ptr.vmem [resolvable:$true] %s161_s21 }
  0x19   : > { %p1245_p9 = pnand %p968_p5, %p36_p7  ;;  %s150_s24 = scalar_lea.sflag [#allocation3], %s149_s6 }
  0x1a   : > { %s1039_s25 = sshra.s32 %s160_s17, 4  ;;  %s1046_s8 = scalar_lea.hbm %s1388_s0, 256  ;;  %s1040_s25 = int_to_ptr.hbm [resolvable:$true] %s1039_s25 }
  0x1b   : > { %s1041_s29 = scalar_lea.hbm %s1040_s25, 128  ;;  %p1043_p10 = pneg %p1245_p9 }
  0x1c   : > { %p1042_p2 = scmp.ne.s32.totalorder %s1040_s25, %s1041_s29  ;;  %p1047_p0 = scmp.lt.s32.totalorder %s1040_s25, %s1388_s0 }
  0x1d   : > { %p1048_p5 = scmp.lt.s32.totalorder %s1046_s8, %s1041_s29 }
  0x1e   : > { %p1044_p12 = pnand %p1043_p10, %p1042_p2 }
  0x1f   : > { %p1049_p7 = por %p1048_p5, %p1047_p0 }
  0x20   : > { %p1045_p13 = pneg %p1044_p12 }
  0x22   : > { %p1050_p11 = pnand %p1049_p7, %p1045_p13 }
  0x24   : > { %1053 = shalt.err (!%p1050_p11)
}
  0x25   : > { %962 = dma.hbm_to_vmem [thread:$0]  (!%p1245_p9), %s160_s17, 2048, %s162_s21, %s150_s24, %s1142_s27, %s1142_s27, %s1143_s28  }
  0x26   : > { %173 = sbr.rel (%p1209_p8) target bundleno = 278 (0x116), region = 32  ;;  %s1265_s6 = sand.u32 (!%p1209_p8), 1, %s1131_s13  }
  0x27   : > { %s698_s11 = sshll.u32 (!%p1209_p8), %s1265_s6, 7  ;;  %s176_s20 = scalar_lea.sflag (!%p1209_p8), [#allocation3], %s1265_s6 }
  0x28   : > { %s1271_s25 = scalar_lea.vmem (!%p1209_p8), [#allocation2], %s698_s11 }
  0x2b   : > { %1114 = dma.done.wait (%p1196_p4), %s176_s20, 2048  }
  0x2c   : > { %1116 = vsyncadd (%p1196_p4), %s176_s20, 4294965248 }
  0x2d   : > { %1118 = dma.done.wait (%p41_p1), [#allocation6], 1024  }
  0x2e   : > { %1120 = vsyncadd (%p41_p1), [#allocation6], 4294966272  ;;  %v826_v0 = vld [vmem:[#allocation5 + $0x38] sm:$0xff]  ;;  %v825_v1 = vld [vmem:[#allocation5 + $0x30] sm:$0xff]  ;;  %s1310_s27 = scalar_lea.vmem [#allocation7], %s698_s11  ;;  %s827_s28 = sshll.u32 %s1187_s16, 7 }
  0x2f   : > { %406 = vmatpush.bf16.msra.mxu0 %v826_v0  ;;  %923 = vmatpush.bf16.msra.mxu1 %v826_v0  ;;  %v824_v2 = vld [vmem:[#allocation5 + $0x28] sm:$0xff]  ;;  %v823_v3 = vld [vmem:[#allocation5 + $0x20] sm:$0xff]  ;;  %v822_v4 = vld [vmem:[#allocation5 + $0x18] sm:$0xff]  ;;  %s603_s22 = scalar_lea.hbm %s1391_s3, %s827_s28  ;;  %s604_s16 = sshll.u32 %s1310_s27, 4  ;;  %s605_s16 = int_to_ptr.vmem [resolvable:$true] %s604_s16 }
  0x30   : > { %924 = vmatpush.bf16.msra.mxu2 %v826_v0  ;;  %925 = vmatpush.bf16.msra.mxu3 %v826_v0  ;;  %v821_v5 = vld [vmem:[#allocation5 + $0x10] sm:$0xff]  ;;  %v820_v6 = vld [vmem:[#allocation5 + $0x8] sm:$0xff]  ;;  %v819_v7 = vld [vmem:[#allocation5] sm:$0xff]  ;;  %s606_s24 = sshll.u32 %s603_s22, 4  ;;  %s592_s29 = scalar_lea.sflag [#allocation4], %s1265_s6  ;;  %s607_s24 = int_to_ptr.hbm [resolvable:$true] %s606_s24 }
  0x31   : > { %v803_v8 = vld [vmem:[%s1271_s25] sm:$0xff]  ;;  %v804_v12 = vld [vmem:[%s1271_s25 + $0x8] sm:$0xff]  ;;  %v805_v16 = vld [vmem:[%s1271_s25 + $0x10] sm:$0xff]  ;;  %s1083_s30 = sshra.s32 %s607_s24, 4  ;;  %s1089_s10 = scalar_lea.hbm %s1391_s3, 256  ;;  %s1084_s30 = int_to_ptr.hbm [resolvable:$true] %s1083_s30 }
  0x32   : > { %v807_v9 = vld [vmem:[%s1271_s25 + $0x20] sm:$0xff]  ;;  %v808_v13 = vld [vmem:[%s1271_s25 + $0x28] sm:$0xff]  ;;  %v809_v17 = vld [vmem:[%s1271_s25 + $0x30] sm:$0xff]  ;;  %s1085_s7 = scalar_lea.hbm %s1084_s30, 128  ;;  %p1090_p11 = scmp.lt.s32.totalorder %s1084_s30, %s1391_s3 }
  0x33   : > { %407 = vmatpush.bf16.msra.mxu0 %v825_v1  ;;  %926 = vmatpush.bf16.msra.mxu1 %v825_v1  ;;  %v811_v10 = vld [vmem:[%s1271_s25 + $0x40] sm:$0xff]  ;;  %v812_v14 = vld [vmem:[%s1271_s25 + $0x48] sm:$0xff]  ;;  %v813_v18 = vld [vmem:[%s1271_s25 + $0x50] sm:$0xff]  ;;  %p1086_p1 = scmp.ne.s32.totalorder %s1084_s30, %s1085_s7  ;;  %p1091_p9 = scmp.lt.s32.totalorder %s1089_s10, %s1085_s7 }
  0x34   : > { %927 = vmatpush.bf16.msra.mxu2 %v825_v1  ;;  %928 = vmatpush.bf16.msra.mxu3 %v825_v1  ;;  %v815_v11 = vld [vmem:[%s1271_s25 + $0x60] sm:$0xff]  ;;  %v816_v15 = vld [vmem:[%s1271_s25 + $0x68] sm:$0xff]  ;;  %v817_v19 = vld [vmem:[%s1271_s25 + $0x70] sm:$0xff] }
  0x35   : > { %v806_v20 = vld [vmem:[%s1271_s25 + $0x18] sm:$0xff]  ;;  %v1300_v26 = vld [vmem:[%s1390_s2] ss:$0 sm:$0xff]  ;;  %p1087_p4 = pnand %p1086_p1, %p1235_p3  ;;  %p1092_p2 = por %p1091_p9, %p1090_p11 }
  0x36   : > { %v810_v21 = vld [vmem:[%s1271_s25 + $0x38] sm:$0xff] }
  0x37   : > { %408 = vmatpush.bf16.msra.mxu0 %v824_v2  ;;  %929 = vmatpush.bf16.msra.mxu1 %v824_v2  ;;  %v814_v22 = vld [vmem:[%s1271_s25 + $0x58] sm:$0xff]  ;;  %p1088_p8 = pneg %p1087_p4 }
  0x38   : > { %930 = vmatpush.bf16.msra.mxu2 %v824_v2  ;;  %931 = vmatpush.bf16.msra.mxu3 %v824_v2  ;;  %v818_v23 = vld [vmem:[%s1271_s25 + $0x78] sm:$0xff] }
  0x39   : > { %p1093_p10 = pnand %p1092_p2, %p1088_p8 }
  0x3b   : > { %409 = vmatpush.bf16.msra.mxu0 %v823_v3  ;;  %932 = vmatpush.bf16.msra.mxu1 %v823_v3 }
  0x3c   : > { %933 = vmatpush.bf16.msra.mxu2 %v823_v3  ;;  %934 = vmatpush.bf16.msra.mxu3 %v823_v3 }
  0x3f   : > { %410 = vmatpush.bf16.msra.mxu0 %v822_v4  ;;  %935 = vmatpush.bf16.msra.mxu1 %v822_v4 }
  0x40   : > { %936 = vmatpush.bf16.msra.mxu2 %v822_v4  ;;  %937 = vmatpush.bf16.msra.mxu3 %v822_v4 }
  0x43   : > { %411 = vmatpush.bf16.msra.mxu0 %v821_v5  ;;  %938 = vmatpush.bf16.msra.mxu1 %v821_v5 }
  0x44   : > { %939 = vmatpush.bf16.msra.mxu2 %v821_v5  ;;  %940 = vmatpush.bf16.msra.mxu3 %v821_v5 }
  0x47   : > { %412 = vmatpush.bf16.msra.mxu0 %v820_v6  ;;  %941 = vmatpush.bf16.msra.mxu1 %v820_v6 }
  0x48   : > { %942 = vmatpush.bf16.msra.mxu2 %v820_v6  ;;  %943 = vmatpush.bf16.msra.mxu3 %v820_v6 }
  0x4b   : > { %413 = vmatpush.bf16.msra.mxu0 %v819_v7  ;;  %944 = vmatpush.bf16.msra.mxu1 %v819_v7 }
  0x4c   : > { %945 = vmatpush.bf16.msra.mxu2 %v819_v7  ;;  %946 = vmatpush.bf16.msra.mxu3 %v819_v7 }
  0x4e   : > { %414 = vmatmul.bf16.vlgmr.msra.gmra.mxu0 %v803_v8  ;;  %434 = vmatmul.bf16.vlgmr.msra.gmra.mxu1 %v807_v9 }
  0x4f   : > { %454 = vmatmul.bf16.vlgmr.msra.gmra.mxu2 %v811_v10  ;;  %474 = vmatmul.bf16.vlgmr.msra.gmra.mxu3 %v815_v11 }
  0x5e   : > { %419 = vmatmul.bf16.gmra.mxu0 %v804_v12  ;;  %439 = vmatmul.bf16.gmra.mxu1 %v808_v13 }
  0x5f   : > { %459 = vmatmul.bf16.gmra.mxu2 %v812_v14  ;;  %479 = vmatmul.bf16.gmra.mxu3 %v816_v15 }
  0x6e   : > { %424 = vmatmul.bf16.gmra.mxu0 %v805_v16  ;;  %444 = vmatmul.bf16.gmra.mxu1 %v809_v17 }
  0x6f   : > { %464 = vmatmul.bf16.gmra.mxu2 %v813_v18  ;;  %484 = vmatmul.bf16.gmra.mxu3 %v817_v19 }
  0x7e   : > { %429 = vmatmul.bf16.gmra.mxu0 %v806_v20  ;;  %449 = vmatmul.bf16.gmra.mxu1 %v810_v21 }
  0x7f   : > { %469 = vmatmul.bf16.gmra.mxu2 %v814_v22  ;;  %489 = vmatmul.bf16.gmra.mxu3 %v818_v23 }
  0xcb   : > { %v415_v24 = vpop.f32.mrf.mxu0  ;;  %v435_v25 = vpop.f32.mrf.mxu1 }
  0xcc   : > { %v416_v27 = vadd.f32 %v1300_v26, %v415_v24  ;;  %v436_v28 = vadd.f32 %v1300_v26, %v435_v25 }
  0xce   : > { %v495_v35 = vmax.f32 %v416_v27, 0.0  ;;  %v503_v36 = vmax.f32 %v436_v28, 0.0 }
  0xd2   : > { %v455_v29 = vpop.f32.mrf.mxu2  ;;  %v475_v30 = vpop.f32.mrf.mxu3 }
  0xd3   : > { %v417_v31 = vpop.f32.mrf.mxu0  ;;  %v437_v32 = vpop.f32.mrf.mxu1  ;;  %v456_v41 = vadd.f32 %v1300_v26, %v455_v29  ;;  %v476_v42 = vadd.f32 %v1300_v26, %v475_v30 }
  0xd4   : > { %v418_v33 = vadd.f32 %v1300_v26, %v417_v31  ;;  %v438_v34 = vadd.f32 %v1300_v26, %v437_v32 }
  0xd5   : > { %v511_v49 = vmax.f32 %v456_v41, 0.0  ;;  %v519_v50 = vmax.f32 %v476_v42, 0.0 }
  0xd6   : > { %v496_v37 = vmax.f32 %v418_v33, 0.0  ;;  %v504_v38 = vmax.f32 %v438_v34, 0.0 }
  0xd8   : > { %v831_v39 = vpack.c.bf16 %v496_v37, %v495_v35  ;;  %v851_v40 = vpack.c.bf16 %v504_v38, %v503_v36 }
  0xda   : > { %832 = vst [vmem:[%s1310_s27] sm:$0xff] %v831_v39   ;;  %v457_v43 = vpop.f32.mrf.mxu2  ;;  %v477_v44 = vpop.f32.mrf.mxu3 }
  0xdb   : > { %911 = vst [vmem:[%s1310_s27 + $0x20] sm:$0xff] %v851_v40   ;;  %v458_v45 = vadd.f32 %v1300_v26, %v457_v43  ;;  %v478_v46 = vadd.f32 %v1300_v26, %v477_v44  ;;  %v420_v47 = vpop.f32.mrf.mxu0  ;;  %v440_v48 = vpop.f32.mrf.mxu1 }
  0xdc   : > { %v421_v55 = vadd.f32 %v1300_v26, %v420_v47  ;;  %v441_v56 = vadd.f32 %v1300_v26, %v440_v48 }
  0xdd   : > { %v512_v51 = vmax.f32 %v458_v45, 0.0  ;;  %v520_v52 = vmax.f32 %v478_v46, 0.0 }
  0xde   : > { %v497_v63 = vmax.f32 %v421_v55, 0.0  ;;  %v505_v0 = vmax.f32 %v441_v56, 0.0 }
  0xdf   : > { %v871_v53 = vpack.c.bf16 %v512_v51, %v511_v49  ;;  %v891_v54 = vpack.c.bf16 %v520_v52, %v519_v50 }
  0xe1   : > { %915 = vst [vmem:[%s1310_s27 + $0x40] sm:$0xff] %v871_v53  }
  0xe2   : > { %919 = vst [vmem:[%s1310_s27 + $0x60] sm:$0xff] %v891_v54   ;;  %v460_v57 = vpop.f32.mrf.mxu2  ;;  %v480_v58 = vpop.f32.mrf.mxu3 }
  0xe3   : > { %v422_v59 = vpop.f32.mrf.mxu0  ;;  %v442_v60 = vpop.f32.mrf.mxu1  ;;  %v461_v5 = vadd.f32 %v1300_v26, %v460_v57  ;;  %v481_v6 = vadd.f32 %v1300_v26, %v480_v58 }
  0xe4   : > { %v423_v61 = vadd.f32 %v1300_v26, %v422_v59  ;;  %v443_v62 = vadd.f32 %v1300_v26, %v442_v60 }
  0xe5   : > { %v513_v13 = vmax.f32 %v461_v5, 0.0  ;;  %v521_v14 = vmax.f32 %v481_v6, 0.0 }
  0xe6   : > { %v498_v1 = vmax.f32 %v423_v61, 0.0  ;;  %v506_v2 = vmax.f32 %v443_v62, 0.0 }
  0xe8   : > { %v836_v3 = vpack.c.bf16 %v498_v1, %v497_v63  ;;  %v856_v4 = vpack.c.bf16 %v506_v2, %v505_v0 }
  0xea   : > { %908 = vst [vmem:[%s1310_s27 + $0x8] sm:$0xff] %v836_v3   ;;  %v462_v7 = vpop.f32.mrf.mxu2  ;;  %v482_v8 = vpop.f32.mrf.mxu3 }
  0xeb   : > { %912 = vst [vmem:[%s1310_s27 + $0x28] sm:$0xff] %v856_v4   ;;  %v463_v9 = vadd.f32 %v1300_v26, %v462_v7  ;;  %v483_v10 = vadd.f32 %v1300_v26, %v482_v8  ;;  %v425_v11 = vpop.f32.mrf.mxu0  ;;  %v445_v12 = vpop.f32.mrf.mxu1 }
  0xec   : > { %v426_v19 = vadd.f32 %v1300_v26, %v425_v11  ;;  %v446_v20 = vadd.f32 %v1300_v26, %v445_v12 }
  0xed   : > { %v514_v15 = vmax.f32 %v463_v9, 0.0  ;;  %v522_v16 = vmax.f32 %v483_v10, 0.0 }
  0xee   : > { %v499_v28 = vmax.f32 %v426_v19, 0.0  ;;  %v507_v29 = vmax.f32 %v446_v20, 0.0 }
  0xef   : > { %v876_v17 = vpack.c.bf16 %v514_v15, %v513_v13  ;;  %v896_v18 = vpack.c.bf16 %v522_v16, %v521_v14 }
  0xf1   : > { %916 = vst [vmem:[%s1310_s27 + $0x48] sm:$0xff] %v876_v17  }
  0xf2   : > { %920 = vst [vmem:[%s1310_s27 + $0x68] sm:$0xff] %v896_v18   ;;  %v465_v21 = vpop.f32.mrf.mxu2  ;;  %v485_v22 = vpop.f32.mrf.mxu3 }
  0xf3   : > { %v427_v23 = vpop.f32.mrf.mxu0  ;;  %v447_v24 = vpop.f32.mrf.mxu1  ;;  %v466_v34 = vadd.f32 %v1300_v26, %v465_v21  ;;  %v486_v35 = vadd.f32 %v1300_v26, %v485_v22 }
  0xf4   : > { %v428_v25 = vadd.f32 %v1300_v26, %v427_v23  ;;  %v448_v27 = vadd.f32 %v1300_v26, %v447_v24 }
  0xf5   : > { %v515_v42 = vmax.f32 %v466_v34, 0.0  ;;  %v523_v43 = vmax.f32 %v486_v35, 0.0 }
  0xf6   : > { %v500_v30 = vmax.f32 %v428_v25, 0.0  ;;  %v508_v31 = vmax.f32 %v448_v27, 0.0 }
  0xf8   : > { %v841_v32 = vpack.c.bf16 %v500_v30, %v499_v28  ;;  %v861_v33 = vpack.c.bf16 %v508_v31, %v507_v29 }
  0xfa   : > { %909 = vst [vmem:[%s1310_s27 + $0x10] sm:$0xff] %v841_v32   ;;  %v467_v36 = vpop.f32.mrf.mxu2  ;;  %v487_v37 = vpop.f32.mrf.mxu3 }
  0xfb   : > { %913 = vst [vmem:[%s1310_s27 + $0x30] sm:$0xff] %v861_v33   ;;  %v468_v38 = vadd.f32 %v1300_v26, %v467_v36  ;;  %v488_v39 = vadd.f32 %v1300_v26, %v487_v37  ;;  %v430_v40 = vpop.f32.mrf.mxu0  ;;  %v450_v41 = vpop.f32.mrf.mxu1 }
  0xfc   : > { %v431_v48 = vadd.f32 %v1300_v26, %v430_v40  ;;  %v451_v49 = vadd.f32 %v1300_v26, %v450_v41 }
  0xfd   : > { %v516_v44 = vmax.f32 %v468_v38, 0.0  ;;  %v524_v45 = vmax.f32 %v488_v39, 0.0 }
  0xfe   : > { %v501_v56 = vmax.f32 %v431_v48, 0.0  ;;  %v509_v57 = vmax.f32 %v451_v49, 0.0 }
  0xff   : > { %v881_v46 = vpack.c.bf16 %v516_v44, %v515_v42  ;;  %v901_v47 = vpack.c.bf16 %v524_v45, %v523_v43 }
 0x101   : > { %917 = vst [vmem:[%s1310_s27 + $0x50] sm:$0xff] %v881_v46  }
 0x102   : > { %921 = vst [vmem:[%s1310_s27 + $0x70] sm:$0xff] %v901_v47   ;;  %v470_v50 = vpop.f32.mrf.mxu2  ;;  %v490_v51 = vpop.f32.mrf.mxu3 }
 0x103   : > { %v432_v52 = vpop.f32.mrf.mxu0  ;;  %v452_v53 = vpop.f32.mrf.mxu1  ;;  %v471_v62 = vadd.f32 %v1300_v26, %v470_v50  ;;  %v491_v63 = vadd.f32 %v1300_v26, %v490_v51 }
 0x104   : > { %v433_v54 = vadd.f32 %v1300_v26, %v432_v52  ;;  %v453_v55 = vadd.f32 %v1300_v26, %v452_v53 }
 0x105   : > { %v517_v4 = vmax.f32 %v471_v62, 0.0  ;;  %v525_v5 = vmax.f32 %v491_v63, 0.0 }
 0x106   : > { %v502_v58 = vmax.f32 %v433_v54, 0.0  ;;  %v510_v59 = vmax.f32 %v453_v55, 0.0 }
 0x108   : > { %v846_v60 = vpack.c.bf16 %v502_v58, %v501_v56  ;;  %v866_v61 = vpack.c.bf16 %v510_v59, %v509_v57 }
 0x10a   : > { %910 = vst [vmem:[%s1310_s27 + $0x18] sm:$0xff] %v846_v60   ;;  %v472_v0 = vpop.f32.mrf.mxu2  ;;  %v492_v1 = vpop.f32.mrf.mxu3 }
 0x10b   : > { %914 = vst [vmem:[%s1310_s27 + $0x38] sm:$0xff] %v866_v61   ;;  %v473_v2 = vadd.f32 %v1300_v26, %v472_v0  ;;  %v493_v3 = vadd.f32 %v1300_v26, %v492_v1 }
 0x10d   : > { %v518_v6 = vmax.f32 %v473_v2, 0.0  ;;  %v526_v7 = vmax.f32 %v493_v3, 0.0 }
 0x10f   : > { %v886_v8 = vpack.c.bf16 %v518_v6, %v517_v4  ;;  %v906_v9 = vpack.c.bf16 %v526_v7, %v525_v5 }
 0x111   : > { %918 = vst [vmem:[%s1310_s27 + $0x58] sm:$0xff] %v886_v8  }
 0x112   : > { %922 = vst [vmem:[%s1310_s27 + $0x78] sm:$0xff] %v906_v9  }
 0x113   : > { %1096 = shalt.err (!%p1093_p10)
}
 0x114   : > { %s1144_s6 = smov 64   ;;  %s1145_s25 = smov 4  }
 0x115   : > { %953 = dma.vmem_to_hbm [thread:$0]  (%p1235_p3), %s605_s16, 2048, %s607_s24, %s592_s29, %s1144_s6, %s1144_s6, %s1145_s25  }
 0x116 PF: > { %s621_s18 = sand.u32 1, %s1127_s12   ;;  %p1397_p12 = scmp.ge.s32.totalorder %s1139_s15, 2 }
 0x117   : > { %s622_s23 = scalar_lea.sflag [#allocation4], %s621_s18 }
 0x118   : > { %p964_p13 = pnand %p1397_p12, %p1201_p6 }
 0x11a   : > { %p965_p0 = pneg %p964_p13 }
 0x11c   : > { %1122 = dma.done.wait (%p965_p0), %s622_s23, 2048  }
 0x11d   : > { %1124 = vsyncadd (%p965_p0), %s622_s23, 4294965248  ;;  %p17_p5 = scmp.ge.s32.totalorder %s1219_s26, 4   ;;  %s1398_s12 = smov %s1131_s13 }
 0x11e   : > { %s1399_s13 = smov %s1135_s14  ;;  %s1400_s14 = smov %s1231_s4 }
 0x11f   : > { %s1401_s15 = smov %s1219_s26  ;;  %19 = sbr.rel (!%p17_p5) target bundleno = 6 (0x6), region = 81 }
 0x124   :  { %628 = vsyncpa [#allocation3], 1 }
 0x125   :  { %630 = vsyncpa [#allocation3 + $0x1], 1 }
 0x126   :  { %631 = vsyncpa [#allocation6], 1 }
 0x127   :  { %632 = vsyncpa [#allocation4], 1 }
 0x128   :  { %634 = vsyncpa [#allocation4 + $0x1], 1 }

</bundles_post_ra>
